<compile_context>
chip_gen: v5e
topology: v5e:2x2
jax: 0.10.0
libtpu: 0.0.40
codegen_flags: <defaults>
</compile_context>

<pallas_src>
import functools

import jax
import jax.numpy as jnp
from jax.experimental import pallas as pl
from jax.experimental.pallas import tpu as pltpu

_LANE = 128
_SUBLANE = 8


def _round_up(x, m):
    return ((x + m - 1) // m) * m


# ----------------------------------------------------------------------------
# Pallas kernel: fused  out = relu(sum_i x_i @ W1_i + b1) @ W2 + b2
# ----------------------------------------------------------------------------
def _make_mlp_kernel(n_inputs):
    def kernel(*refs):
        x_refs = refs[:n_inputs]
        w1_refs = refs[n_inputs:2 * n_inputs]
        b1_ref, w2_ref, b2_ref, o_ref = refs[2 * n_inputs:]

        # Layer 1: per-argument MXU accumulates (the concat is fused here).
        h = jnp.dot(x_refs[0][...], w1_refs[0][...],
                    preferred_element_type=jnp.float32)
        for x_r, w_r in zip(x_refs[1:], w1_refs[1:]):
            h = h + jnp.dot(x_r[...], w_r[...],
                            preferred_element_type=jnp.float32)
        h = jnp.maximum(h + b1_ref[...], 0.0)              # bias + ReLU in f32

        # Layer 2: bf16 operands, f32 accumulation, f32 bias add.
        o = jnp.dot(h.astype(w2_ref.dtype), w2_ref[...],
                    preferred_element_type=jnp.float32)
        o_ref[...] = (o + b2_ref[...]).astype(o_ref.dtype)
    return kernel


@functools.partial(jax.jit, static_argnames=("d_out", "tm"))
def mlp_forward(xs, w1s, b1, w2, b2, *, d_out, tm=256):
    """xs: tuple of [B, D_i]; w1s: tuple of [D_i, Hp] bf16;
    b1: [1, Hp] f32; w2: [Hp, Dp] bf16; b2: [1, Dp] f32.  Returns [B, d_out] f32."""
    n_in = len(xs)
    B = xs[0].shape[0]
    Hp = w2.shape[0]
    Dp = w2.shape[1]
    d_ins = tuple(x.shape[1] for x in xs)

    # Batch tiling: up to `tm` rows per grid step; ragged batch -> zero pad.
    tm_eff = min(tm, _round_up(B, _SUBLANE))
    Bp = _round_up(B, tm_eff)
    xs = tuple(
        (jnp.pad(x, ((0, Bp - B), (0, 0))) if Bp > B else x).astype(jnp.bfloat16)
        for x in xs)
    grid = (Bp // tm_eff,)

    x_specs = [pl.BlockSpec((tm_eff, d), lambda i: (i, 0)) for d in d_ins]
    w1_specs = [pl.BlockSpec((d, Hp), lambda i: (0, 0)) for d in d_ins]

    flops = 2 * Bp * (sum(d_ins) * Hp + Hp * Dp)
    bytes_accessed = (
        sum(Bp * d * 2 for d in d_ins)          # bf16 inputs
        + sum(d * Hp * 2 for d in d_ins)        # bf16 W1 slices
        + Hp * 4 + Hp * Dp * 2 + Dp * 4         # b1 (f32), W2 (bf16), b2 (f32)
        + Bp * Dp * 4)                          # f32 output
    cost = pl.CostEstimate(flops=flops, transcendentals=0,
                           bytes_accessed=bytes_accessed)

    out = pl.pallas_call(
        _make_mlp_kernel(n_in),
        out_shape=jax.ShapeDtypeStruct((Bp, Dp), jnp.float32),
        grid_spec=pltpu.PrefetchScalarGridSpec(
            num_scalar_prefetch=0,
            grid=grid,
            in_specs=x_specs + w1_specs + [
                pl.BlockSpec((1, Hp), lambda i: (0, 0)),      # b1 (resident)
                pl.BlockSpec((Hp, Dp), lambda i: (0, 0)),     # W2 (resident)
                pl.BlockSpec((1, Dp), lambda i: (0, 0)),      # b2 (resident)
            ],
            out_specs=pl.BlockSpec((tm_eff, Dp), lambda i: (i, 0)),
        ),
        compiler_params=pltpu.CompilerParams(
            dimension_semantics=("parallel",),
            vmem_limit_bytes=32 * 1024 * 1024,
        ),
        cost_estimate=cost,
    )(*xs, *w1s, b1, w2, b2)

    return out[:B, :d_out]


# ----------------------------------------------------------------------------
# Wrapped mapping module (the `wrapped` nn.Module): MLP over the quantized
# feature-vector arguments.  Weights are padded to lane multiples and cast to
# bf16 once at construction time.
# ----------------------------------------------------------------------------
class MappingMLP:
    def __init__(self, key, d_ins, d_hidden, d_out, *, tm=256):
        d_ins = tuple(d_ins)
        d_in = sum(d_ins)
        hp = _round_up(d_hidden, _LANE)
        dp = _round_up(d_out, _LANE)

        k1, k2, k3, k4 = jax.random.split(key, 4)
        s1 = 1.0 / jnp.sqrt(d_in)
        s2 = 1.0 / jnp.sqrt(d_hidden)
        w1 = jax.random.uniform(k1, (d_in, d_hidden), jnp.float32, -s1, s1)
        b1 = jax.random.uniform(k2, (1, d_hidden), jnp.float32, -s1, s1)
        w2 = jax.random.uniform(k3, (d_hidden, d_out), jnp.float32, -s2, s2)
        b2 = jax.random.uniform(k4, (1, d_out), jnp.float32, -s2, s2)

        # f32 masters (for reference checks / original semantics).
        self.w1_f32, self.b1_f32, self.w2_f32, self.b2_f32 = w1, b1, w2, b2

        # Zero-pad hidden/output feature dims to lane multiples (exact math).
        w1p = jnp.pad(w1, ((0, 0), (0, hp - d_hidden)))
        b1p = jnp.pad(b1, ((0, 0), (0, hp - d_hidden)))
        w2p = jnp.pad(w2, ((0, hp - d_hidden), (0, dp - d_out)))
        b2p = jnp.pad(b2, ((0, 0), (0, dp - d_out)))

        # Split W1 per input argument so the kernel fuses the concat.
        splits, off = [], 0
        for d in d_ins:
            splits.append(w1p[off:off + d].astype(jnp.bfloat16))
            off += d
        self.w1s = tuple(splits)
        self.b1 = b1p
        self.w2 = w2p.astype(jnp.bfloat16)
        self.b2 = b2p

        self.d_ins = d_ins
        self.d_out = d_out
        self.tm = tm

    def __call__(self, *args):
        assert len(args) == len(self.d_ins)
        return mlp_forward(tuple(args), self.w1s, self.b1, self.w2, self.b2,
                           d_out=self.d_out, tm=self.tm)


# ----------------------------------------------------------------------------
# SimpleQuantizationWrapper — same forward() semantics as the PyTorch module.
# ----------------------------------------------------------------------------
class SimpleQuantizationWrapper:
    def __init__(self, wrapped):
        self.wrapped = wrapped
        self.save_tensors = False
        self.saved_tensors = []
        self.quantized_mapping = None

    def forward(self, *args, **kwargs):
        ret = self.wrapped(*args, **kwargs)
        if self.save_tensors:
            self.saved_tensors.append((args, kwargs, ret))
        return ret

    __call__ = forward

    def enable_quantization_recorder(self):
        assert self.quantized_mapping is None
        self.save_tensors = True
        self.saved_tensors = []

    def finalize_quantization_recorder(self):
        try:
            self.save_tensors = False
            return self.saved_tensors
        finally:
            self.saved_tensors = []

    # TODO(synk): forward_quantized / quantize_mapping_module /
    # print_quantized_mapping are host-side python-dict lookups over integer
    # tuples (no tensor compute); no Pallas equivalent, left unimplemented.


# ----------------------------------------------------------------------------
if __name__ == "__main__":
    key = jax.random.PRNGKey(0)
    k_param, k_x1, k_x2 = jax.random.split(key, 3)

    B, D1, D2, H, DOUT = 16, 32, 32, 128, 16
    module = SimpleQuantizationWrapper(MappingMLP(k_param, (D1, D2), H, DOUT))

    # Quantized input vectors (e.g. embeddings of quantized codes).
    x1 = jax.random.normal(k_x1, (B, D1), jnp.float32)
    x2 = jax.random.normal(k_x2, (B, D2), jnp.float32)

    module.enable_quantization_recorder()
    out = module(x1, x2)
    out = jax.block_until_ready(out)
    saved = module.finalize_quantization_recorder()
    assert len(saved) == 1 and saved[0][2].shape == (B, DOUT)

    wrapped = module.wrapped

    # Reference 1: plain-JAX forward using the same bf16 matmul operands.
    xcat_bf = jnp.concatenate([x1, x2], axis=-1).astype(jnp.bfloat16)
    w1_bf = jnp.concatenate(wrapped.w1s, axis=0)           # (Din, Hp) bf16
    h_ref = jnp.maximum(
        jnp.dot(xcat_bf, w1_bf, preferred_element_type=jnp.float32)
        + wrapped.b1, 0.0)
    ref_bf = (jnp.dot(h_ref.astype(jnp.bfloat16), wrapped.w2,
                      preferred_element_type=jnp.float32)
              + wrapped.b2)[:, :DOUT]
    assert jnp.allclose(out, ref_bf, atol=1e-2, rtol=1e-2)

    # Reference 2: original full-f32 semantics (loose tol for bf16 operands).
    xcat = jnp.concatenate([x1, x2], axis=-1)
    ref = jnp.maximum(xcat @ wrapped.w1_f32 + wrapped.b1_f32, 0.0)
    ref = ref @ wrapped.w2_f32 + wrapped.b2_f32
    assert jnp.allclose(out, ref, atol=5e-2, rtol=5e-2)

    print("KERNEL_OK")
</pallas_src>

<mosaic_0001>
module attributes {stable_mosaic.version = 11 : i64} {
  func.func @kernel(%arg0: i32, %arg1: memref<16x32xbf16, #tpu.memory_space<vmem>>, %arg2: memref<16x32xbf16, #tpu.memory_space<vmem>>, %arg3: memref<32x128xbf16, #tpu.memory_space<vmem>>, %arg4: memref<32x128xbf16, #tpu.memory_space<vmem>>, %arg5: memref<1x128xf32, #tpu.memory_space<vmem>>, %arg6: memref<128x128xbf16, #tpu.memory_space<vmem>>, %arg7: memref<1x128xf32, #tpu.memory_space<vmem>>, %arg8: memref<16x128xf32, #tpu.memory_space<vmem>>) attributes {dimension_semantics = [#tpu.dimension_semantics<parallel>], iteration_bounds = array<i64: 1>, scalar_prefetch = 0 : i64, scratch_operands = 0 : i64, tpu.core_type = #tpu.core_type<tc>, window_params = [{transform_indices = @transform_0, window_bounds = array<i64: 16, 32>}, {transform_indices = @transform_1, window_bounds = array<i64: 16, 32>}, {pipeline_mode = #tpu.pipeline_mode<synchronous>, transform_indices = @transform_2, window_bounds = array<i64: 32, 128>}, {pipeline_mode = #tpu.pipeline_mode<synchronous>, transform_indices = @transform_3, window_bounds = array<i64: 32, 128>}, {pipeline_mode = #tpu.pipeline_mode<synchronous>, transform_indices = @transform_4, window_bounds = array<i64: 1, 128>}, {pipeline_mode = #tpu.pipeline_mode<synchronous>, transform_indices = @transform_5, window_bounds = array<i64: 128, 128>}, {pipeline_mode = #tpu.pipeline_mode<synchronous>, transform_indices = @transform_6, window_bounds = array<i64: 1, 128>}, {transform_indices = @transform_7, window_bounds = array<i64: 16, 128>}]} {
    %c0 = arith.constant 0 : index
    %c0_0 = arith.constant 0 : index
    %0 = vector.load %arg1[%c0, %c0_0] : memref<16x32xbf16, #tpu.memory_space<vmem>>, vector<16x32xbf16>
    %c0_1 = arith.constant 0 : index
    %c0_2 = arith.constant 0 : index
    %1 = vector.load %arg3[%c0_1, %c0_2] : memref<32x128xbf16, #tpu.memory_space<vmem>>, vector<32x128xbf16>
    %cst = arith.constant dense<0.000000e+00> : vector<16x128xf32>
    %2 = tpu.matmul %0, %1, %cst {dimension_numbers = #tpu.dot_dimension_numbers<[1], [0], [0], [1], [0, 0, 1, 1], [], []>} : vector<16x32xbf16>, vector<32x128xbf16>, vector<16x128xf32> -> vector<16x128xf32>
    %c0_3 = arith.constant 0 : index
    %c0_4 = arith.constant 0 : index
    %3 = vector.load %arg2[%c0_3, %c0_4] : memref<16x32xbf16, #tpu.memory_space<vmem>>, vector<16x32xbf16>
    %c0_5 = arith.constant 0 : index
    %c0_6 = arith.constant 0 : index
    %4 = vector.load %arg4[%c0_5, %c0_6] : memref<32x128xbf16, #tpu.memory_space<vmem>>, vector<32x128xbf16>
    %cst_7 = arith.constant dense<0.000000e+00> : vector<16x128xf32>
    %5 = tpu.matmul %3, %4, %cst_7 {dimension_numbers = #tpu.dot_dimension_numbers<[1], [0], [0], [1], [0, 0, 1, 1], [], []>} : vector<16x32xbf16>, vector<32x128xbf16>, vector<16x128xf32> -> vector<16x128xf32>
    %6 = arith.addf %2, %5 : vector<16x128xf32>
    %c0_8 = arith.constant 0 : index
    %c0_9 = arith.constant 0 : index
    %7 = vector.load %arg5[%c0_8, %c0_9] : memref<1x128xf32, #tpu.memory_space<vmem>>, vector<1x128xf32>
    %8 = vector.broadcast %7 : vector<1x128xf32> to vector<16x128xf32>
    %9 = arith.addf %6, %8 : vector<16x128xf32>
    %cst_10 = arith.constant 0.000000e+00 : f32
    %10 = vector.broadcast %cst_10 : f32 to vector<16x128xf32>
    %11 = arith.maximumf %9, %10 : vector<16x128xf32>
    %12 = arith.truncf %11 : vector<16x128xf32> to vector<16x128xbf16>
    %c0_11 = arith.constant 0 : index
    %c0_12 = arith.constant 0 : index
    %13 = vector.load %arg6[%c0_11, %c0_12] : memref<128x128xbf16, #tpu.memory_space<vmem>>, vector<128x128xbf16>
    %cst_13 = arith.constant dense<0.000000e+00> : vector<16x128xf32>
    %14 = tpu.matmul %12, %13, %cst_13 {dimension_numbers = #tpu.dot_dimension_numbers<[1], [0], [0], [1], [0, 0, 1, 1], [], []>} : vector<16x128xbf16>, vector<128x128xbf16>, vector<16x128xf32> -> vector<16x128xf32>
    %c0_14 = arith.constant 0 : index
    %c0_15 = arith.constant 0 : index
    %15 = vector.load %arg7[%c0_14, %c0_15] : memref<1x128xf32, #tpu.memory_space<vmem>>, vector<1x128xf32>
    %16 = vector.broadcast %15 : vector<1x128xf32> to vector<16x128xf32>
    %17 = arith.addf %14, %16 : vector<16x128xf32>
    %c0_16 = arith.constant 0 : index
    %c0_17 = arith.constant 0 : index
    %18 = vector.load %arg8[%c0_16, %c0_17] : memref<16x128xf32, #tpu.memory_space<vmem>>, vector<16x128xf32>
    tpu.vector_store %arg8[%c0_16, %c0_17], %17 {strides = array<i32>} : memref<16x128xf32, #tpu.memory_space<vmem>>, vector<16x128xf32>,
    return
  }
  func.func @transform_0(%arg0: i32) -> (i32, i32) {
    %c0_i32 = arith.constant 0 : i32
    %c0_i32_0 = arith.constant 0 : i32
    return %arg0, %c0_i32 : i32, i32
  }
  func.func @transform_1(%arg0: i32) -> (i32, i32) {
    %c0_i32 = arith.constant 0 : i32
    %c0_i32_0 = arith.constant 0 : i32
    return %arg0, %c0_i32 : i32, i32
  }
  func.func @transform_2(%arg0: i32) -> (i32, i32) {
    %c0_i32 = arith.constant 0 : i32
    %c0_i32_0 = arith.constant 0 : i32
    %c0_i32_1 = arith.constant 0 : i32
    return %c0_i32, %c0_i32_0 : i32, i32
  }
  func.func @transform_3(%arg0: i32) -> (i32, i32) {
    %c0_i32 = arith.constant 0 : i32
    %c0_i32_0 = arith.constant 0 : i32
    %c0_i32_1 = arith.constant 0 : i32
    return %c0_i32, %c0_i32_0 : i32, i32
  }
  func.func @transform_4(%arg0: i32) -> (i32, i32) {
    %c0_i32 = arith.constant 0 : i32
    %c0_i32_0 = arith.constant 0 : i32
    %c0_i32_1 = arith.constant 0 : i32
    return %c0_i32, %c0_i32_0 : i32, i32
  }
  func.func @transform_5(%arg0: i32) -> (i32, i32) {
    %c0_i32 = arith.constant 0 : i32
    %c0_i32_0 = arith.constant 0 : i32
    %c0_i32_1 = arith.constant 0 : i32
    return %c0_i32, %c0_i32_0 : i32, i32
  }
  func.func @transform_6(%arg0: i32) -> (i32, i32) {
    %c0_i32 = arith.constant 0 : i32
    %c0_i32_0 = arith.constant 0 : i32
    %c0_i32_1 = arith.constant 0 : i32
    return %c0_i32, %c0_i32_0 : i32, i32
  }
  func.func @transform_7(%arg0: i32) -> (i32, i32) {
    %c0_i32 = arith.constant 0 : i32
    %c0_i32_0 = arith.constant 0 : i32
    return %arg0, %c0_i32 : i32, i32
  }
}

</mosaic_0001>

<bundles_post_ra>
// kernel: mlp_forward.1
= control target key start
LH: loop header
LB: loop body
LE: loop exit
PB: predicated region body
PF: predicated region fallthrough
CT: control target
= control target key end

     0   :  { %12 = vsyncpa [#allocation3], 0  ;;  %s445_s0 = inlined_call_operand.vmem [shape: bf16[16,32], index: 0, kind: input, shape index: {}]   ;;  %s446_s1 = inlined_call_operand.vmem [shape: bf16[16,32], index: 1, kind: input, shape index: {}]   ;;  %s447_s2 = inlined_call_operand.vmem [shape: bf16[32,128], index: 2, kind: input, shape index: {}]   ;;  %s448_s3 = inlined_call_operand.vmem [shape: bf16[32,128], index: 3, kind: input, shape index: {}]   ;;  %s449_s4 = inlined_call_operand.vmem [shape: f32[1,128], index: 4, kind: input, shape index: {}]   ;;  %s450_s5 = inlined_call_operand.hbm [shape: bf16[128,128], index: 5, kind: input, shape index: {}]   ;;  %s451_s6 = inlined_call_operand.vmem [shape: f32[1,128], index: 6, kind: input, shape index: {}]   ;;  %s452_s7 = inlined_call_operand.hbm [shape: f32[16,128], index: 7, kind: output, shape index: {}]  }
   0x1   :  { %13 = vsyncpa [#allocation4], 0  ;;  %s28_s26 = sshll.u32 %s450_s5, 4  ;;  %s369_s27 = smov [#allocation2]   ;;  %s29_s26 = int_to_ptr.hbm [resolvable:$true] %s28_s26 }
   0x2   :  { %s30_s28 = sshll.u32 %s369_s27, 4  ;;  %s370_s29 = smov 64   ;;  %s31_s28 = int_to_ptr.vmem [resolvable:$true] %s30_s28 }
   0x3   :  { %s371_s30 = smov 4  }
   0x4   :  { %36 = dma.hbm_to_vmem [thread:$0]  %s29_s26, 1024, %s31_s28, [#allocation3], %s370_s29, %s370_s29, %s371_s30  }
   0x5   :  { %365 = dma.done.wait [#allocation3], 1024  }
   0x6   :  { %366 = vsyncadd [#allocation3], 4294966272  ;;  %v300_v0 = vld [vmem:[%s448_s3 + $0x8] sm:$0xff]  ;;  %v299_v2 = vld [vmem:[%s448_s3] sm:$0xff]  ;;  %vm73_vm0 = vcmask 261120   ;;  %s372_s19 = smov [#allocation5]  }
   0x7   :  { %v297_v1 = vld [vmem:[%s447_s2 + $0x8] sm:$0xff]  ;;  %83 = vmatpush.bf16.msra.mxu0 %v300_v0  ;;  %v296_v3 = vld [vmem:[%s447_s2] sm:$0xff]  ;;  %v308_v4 = vld [vmem:[#allocation2 + $0x38] sm:$0xff]  ;;  %s222_s20 = sshll.u32 %s372_s19, 4  ;;  %s224_s22 = sshll.u32 %s452_s7, 4  ;;  %s223_s20 = int_to_ptr.vmem [resolvable:$true] %s222_s20  ;;  %s225_s22 = int_to_ptr.hbm [resolvable:$true] %s224_s22 }
   0x8   :  { %117 = vmatpush.bf16.msra.mxu1 %v297_v1  ;;  %202 = vmatpush.bf16.msra.mxu2 %v308_v4  ;;  %v307_v5 = vld [vmem:[#allocation2 + $0x30] sm:$0xff]  ;;  %v298_v6 = vld [vmem:[%s446_s1] sm:$0xff]  ;;  %v306_v8 = vld [vmem:[#allocation2 + $0x28] sm:$0xff]  ;;  %s373_s23 = smov 128   ;;  %s374_s24 = smov 8  }
   0x9   :  { %v295_v7 = vld [vmem:[%s445_s0] sm:$0xff]  ;;  %v304_v10 = vld [vmem:[#allocation2 + $0x18] sm:$0xff]  ;;  %v303_v11 = vld [vmem:[#allocation2 + $0x10] sm:$0xff] }
   0xa   :  { %v305_v9 = vld [vmem:[#allocation2 + $0x20] sm:$0xff]  ;;  %v302_v12 = vld [vmem:[#allocation2 + $0x8] sm:$0xff] }
   0xb   :  { %84 = vmatpush.bf16.msra.mxu0 %v299_v2  ;;  %v301_v13 = vld [vmem:[#allocation2] sm:$0xff] }
   0xc   :  { %118 = vmatpush.bf16.msra.mxu1 %v296_v3  ;;  %203 = vmatpush.bf16.msra.mxu2 %v307_v5  ;;  %v315_v17 = vld [vmem:[%s449_s4] ss:$0 sm:$0xff] }
   0xd   :  { %v316_v26 = vld [vmem:[%s451_s6] ss:$0 sm:$0xff] }
   0xe   :  { %249 = vmatmul.msk.bf16.vlgmr.msra.gmra.mxu0 %vm73_vm0, %v298_v6 }
   0xf   :  { %262 = vmatmul.msk.bf16.vlgmr.msra.gmra.mxu1 %vm73_vm0, %v295_v7 }
  0x10   :  { %204 = vmatpush.bf16.msra.mxu2 %v306_v8 }
  0x14   :  { %205 = vmatpush.bf16.msra.mxu2 %v305_v9 }
  0x18   :  { %206 = vmatpush.bf16.msra.mxu2 %v304_v10 }
  0x1c   :  { %207 = vmatpush.bf16.msra.mxu2 %v303_v11 }
  0x20   :  { %208 = vmatpush.bf16.msra.mxu2 %v302_v12 }
  0x24   :  { %209 = vmatpush.bf16.msra.mxu2 %v301_v13 }
  0x8b   :  { %v86_v14 = vpop.f32.mrf.mxu0 }
  0x8c   :  { %v120_v15 = vpop.f32.mrf.mxu1 }
  0x8d   :  { %v121_v16 = vadd.f32 %v120_v15, %v86_v14 }
  0x8f   :  { %v129_v20 = vadd.f32 %v315_v17, %v121_v16 }
  0x91   :  { %v131_v23 = vmax.f32 %v129_v20, 0.0 }
  0x93   :  { %v88_v18 = vpop.f32.mrf.mxu0 }
  0x94   :  { %v122_v19 = vpop.f32.mrf.mxu1 }
  0x95   :  { %v123_v21 = vadd.f32 %v122_v19, %v88_v18 }
  0x97   :  { %v130_v22 = vadd.f32 %v315_v17, %v123_v21 }
  0x99   :  { %v132_v24 = vmax.f32 %v130_v22, 0.0 }
  0x9b   :  { %v133_v25 = vpack.c.bf16 %v132_v24, %v131_v23 }
  0x9d   :  { %210 = vmatmul.bf16.vlgmr.msra.gmra.mxu2 %v133_v25 }
 0x120   :  { %v211_v27 = vpop.f32.mrf.mxu2 }
 0x121   :  { %v212_v28 = vadd.f32 %v316_v26, %v211_v27 }
 0x123   :  { %216 = vst [vmem:[#allocation5] sm:$0xff] %v212_v28 }
 0x128   :  { %v213_v29 = vpop.f32.mrf.mxu2 }
 0x129   :  { %v214_v30 = vadd.f32 %v316_v26, %v213_v29 }
 0x12b   :  { %217 = vst [vmem:[#allocation5 + $0x8] sm:$0xff] %v214_v30 }
 0x12c   :  { %230 = dma.vmem_to_hbm [thread:$0]  %s223_s20, 256, %s225_s22, [#allocation4], %s373_s23, %s373_s23, %s374_s24  }
 0x12d   :  { %367 = dma.done.wait [#allocation4], 256  }
 0x12e   :  { %368 = vsyncadd [#allocation4], 4294967040 }
 0x12f   :  { %235 = vsyncpa [#allocation3], 1 }
 0x130   :  { %236 = vsyncpa [#allocation4], 1 }

</bundles_post_ra>
